<compile_context>
chip_gen: v7x
topology: tpu7x:2x2x1
jax: 0.10.0
libtpu: 0.0.40
codegen_flags: <defaults>
</compile_context>

<pallas_src>
import functools

import jax
import jax.numpy as jnp
from jax.experimental import pallas as pl
from jax.experimental.pallas import tpu as pltpu


def discriminator_d2_kernel(x_ref, w1_ref, b1_ref, w2_ref, b2_ref, o_ref):
    # fc1 on the MXU: [tb, K] @ [K, ndh], f32 accumulation.
    h = jnp.dot(x_ref[...], w1_ref[...], preferred_element_type=jnp.float32)
    h = h + b1_ref[...]                      # b1: [1, ndh] f32 (broadcast over rows)
    # LeakyReLU(0.2) on the VPU.
    h = jnp.where(h > 0, h, 0.2 * h)
    # fc2 (out_features = 1): VPU multiply + lane reduction instead of an
    # N=1 MXU matmul (which would use 1/128 of the systolic array columns).
    out = jnp.sum(h * w2_ref[...], axis=-1, keepdims=True)   # w2_ref: [1, ndh] f32
    o_ref[...] = (out + b2_ref[0, 0]).astype(o_ref.dtype)


def discriminator_d2(x, w1, b1, w2, b2, *, block_b=256, use_bf16=True):
    """x: [B, resSize]; w1: [resSize, ndh]; b1: [ndh]; w2: [ndh, 1]; b2: [1]."""
    B, K = x.shape
    ndh = w1.shape[1]

    # bf16 activations/weights for the fc1 GEMM (mem-bound at realistic sizes);
    # accumulation and everything after stays f32.
    if use_bf16:
        x_in = x.astype(jnp.bfloat16)
        w1_in = w1.astype(jnp.bfloat16)
    else:
        x_in = x.astype(jnp.float32)
        w1_in = w1.astype(jnp.float32)

    b1_row = b1.reshape(1, ndh).astype(jnp.float32)
    w2_row = w2.reshape(1, ndh).astype(jnp.float32)   # fc2 weight as a lane row
    b2_s = b2.reshape(1, 1).astype(jnp.float32)       # scalar -> SMEM

    # Batch tile: stream x over the batch; if B is small, one full-array block.
    tb = block_b if B > block_b else B
    grid = (pl.cdiv(B, tb),)

    return pl.pallas_call(
        discriminator_d2_kernel,
        out_shape=jax.ShapeDtypeStruct((B, 1), jnp.float32),
        grid=grid,
        in_specs=[
            pl.BlockSpec((tb, K), lambda i: (i, 0)),      # x: tiled over batch
            pl.BlockSpec((K, ndh), lambda i: (0, 0)),     # W1: resident across steps
            pl.BlockSpec((1, ndh), lambda i: (0, 0)),     # b1: resident
            pl.BlockSpec((1, ndh), lambda i: (0, 0)),     # w2 row: resident
            pl.BlockSpec(memory_space=pltpu.SMEM),        # b2: scalar in SMEM
        ],
        out_specs=pl.BlockSpec((tb, 1), lambda i: (i, 0)),
        compiler_params=pltpu.CompilerParams(
            dimension_semantics=("parallel",),            # v7x: shard batch over 2 TCs
            vmem_limit_bytes=64 * 1024 * 1024,            # headroom for big W1 tiles
        ),
    )(x_in, w1_in, b1_row, w2_row, b2_s)
    # TODO(synk): for resSize x ndh weights that exceed VMEM even in bf16, add a
    # trailing "arbitrary" K-grid axis with an f32 accumulator scratch.


def init_params(key, res_size, ndh):
    """Deterministic init mirroring weights_init: Linear W ~ N(0, 0.02), b = 0."""
    k1, k2 = jax.random.split(key)
    # PyTorch stores fc1.weight as [ndh, resSize]; we keep the transposed layout
    # [resSize, ndh] so the kernel computes x @ W1 directly.
    w1 = 0.02 * jax.random.normal(k1, (res_size, ndh), dtype=jnp.float32)
    b1 = jnp.zeros((ndh,), dtype=jnp.float32)
    w2 = 0.02 * jax.random.normal(k2, (ndh, 1), dtype=jnp.float32)
    b2 = jnp.zeros((1,), dtype=jnp.float32)
    return w1, b1, w2, b2


def reference_forward(x, w1, b1, w2, b2):
    h = x @ w1 + b1
    h = jnp.where(h > 0, h, 0.2 * h)
    return h @ w2 + b2


if __name__ == "__main__":
    key = jax.random.PRNGKey(0)
    k_x, k_p = jax.random.split(key)

    B, res_size, ndh = 2, 32, 32  # small shapes consistent with opt.resSize / opt.ndh
    x = jax.random.normal(k_x, (B, res_size), dtype=jnp.float32)
    w1, b1, w2, b2 = init_params(k_p, res_size, ndh)

    ref = reference_forward(x, w1, b1, w2, b2)

    # f32 path: tight check against the pure-JAX reference.
    out_f32 = jax.block_until_ready(
        discriminator_d2(x, w1, b1, w2, b2, use_bf16=False))
    assert out_f32.shape == (B, 1)
    assert jnp.allclose(out_f32, ref, atol=1e-5, rtol=1e-5)

    # bf16 path (default, used for performance): loose check vs f32 reference.
    out_bf16 = jax.block_until_ready(
        discriminator_d2(x, w1, b1, w2, b2, use_bf16=True))
    assert out_bf16.shape == (B, 1)
    assert jnp.allclose(out_bf16, ref, atol=1e-2, rtol=1e-2)

    print("KERNEL_OK")
</pallas_src>

<mosaic_0001>
module attributes {stable_mosaic.version = 11 : i64} {
  func.func @discriminator_d2_kernel(%arg0: i32, %arg1: memref<2x32xf32, #tpu.memory_space<vmem>>, %arg2: memref<32x32xf32, #tpu.memory_space<vmem>>, %arg3: memref<1x32xf32, #tpu.memory_space<vmem>>, %arg4: memref<1x32xf32, #tpu.memory_space<vmem>>, %arg5: memref<1x1xf32, #tpu.memory_space<smem>>, %arg6: memref<2x1xf32, #tpu.memory_space<vmem>>) attributes {dimension_semantics = [#tpu.dimension_semantics<parallel>], iteration_bounds = array<i64: 1>, scalar_prefetch = 0 : i64, scratch_operands = 0 : i64, tpu.core_type = #tpu.core_type<tc>, window_params = [{transform_indices = @transform_0, window_bounds = array<i64: 2, 32>}, {pipeline_mode = #tpu.pipeline_mode<synchronous>, transform_indices = @transform_1, window_bounds = array<i64: 32, 32>}, {pipeline_mode = #tpu.pipeline_mode<synchronous>, transform_indices = @transform_2, window_bounds = array<i64: 1, 32>}, {pipeline_mode = #tpu.pipeline_mode<synchronous>, transform_indices = @transform_3, window_bounds = array<i64: 1, 32>}, {transform_indices = @transform_4, window_bounds = array<i64: 1, 1>}, {transform_indices = @transform_5, window_bounds = array<i64: 2, 1>}]} {
    %c0 = arith.constant 0 : index
    %c0_0 = arith.constant 0 : index
    %0 = vector.load %arg1[%c0, %c0_0] : memref<2x32xf32, #tpu.memory_space<vmem>>, vector<2x32xf32>
    %c0_1 = arith.constant 0 : index
    %c0_2 = arith.constant 0 : index
    %1 = vector.load %arg2[%c0_1, %c0_2] : memref<32x32xf32, #tpu.memory_space<vmem>>, vector<32x32xf32>
    %cst = arith.constant dense<0.000000e+00> : vector<2x32xf32>
    %2 = tpu.matmul %0, %1, %cst {dimension_numbers = #tpu.dot_dimension_numbers<[1], [0], [0], [1], [0, 0, 1, 1], [], []>} : vector<2x32xf32>, vector<32x32xf32>, vector<2x32xf32> -> vector<2x32xf32>
    %c0_3 = arith.constant 0 : index
    %c0_4 = arith.constant 0 : index
    %3 = vector.load %arg3[%c0_3, %c0_4] : memref<1x32xf32, #tpu.memory_space<vmem>>, vector<1x32xf32>
    %4 = vector.broadcast %3 : vector<1x32xf32> to vector<2x32xf32>
    %5 = arith.addf %2, %4 : vector<2x32xf32>
    %cst_5 = arith.constant 0.000000e+00 : f32
    %6 = vector.broadcast %cst_5 : f32 to vector<2x32xf32>
    %7 = arith.cmpf ogt, %5, %6 : vector<2x32xf32>
    %cst_6 = arith.constant 2.000000e-01 : f32
    %8 = vector.broadcast %cst_6 : f32 to vector<2x32xf32>
    %9 = arith.mulf %8, %5 : vector<2x32xf32>
    %10 = arith.select %7, %5, %9 : vector<2x32xi1>, vector<2x32xf32>
    %c0_7 = arith.constant 0 : index
    %c0_8 = arith.constant 0 : index
    %11 = vector.load %arg4[%c0_7, %c0_8] : memref<1x32xf32, #tpu.memory_space<vmem>>, vector<1x32xf32>
    %12 = vector.broadcast %11 : vector<1x32xf32> to vector<2x32xf32>
    %13 = arith.mulf %10, %12 : vector<2x32xf32>
    %cst_9 = arith.constant dense<0.000000e+00> : vector<2xf32>
    %14 = vector.multi_reduction <add>, %13, %cst_9 [1] : vector<2x32xf32> to vector<2xf32>
    %15 = vector.shape_cast %14 : vector<2xf32> to vector<2x1xf32>
    %c0_10 = arith.constant 0 : index
    %c0_11 = arith.constant 0 : index
    %16 = memref.load %arg5[%c0_10, %c0_11] : memref<1x1xf32, #tpu.memory_space<smem>>
    %17 = vector.broadcast %16 : f32 to vector<2x1xf32>
    %18 = arith.addf %15, %17 : vector<2x1xf32>
    %c0_12 = arith.constant 0 : index
    %c0_13 = arith.constant 0 : index
    %19 = vector.load %arg6[%c0_12, %c0_13] : memref<2x1xf32, #tpu.memory_space<vmem>>, vector<2x1xf32>
    tpu.vector_store %arg6[%c0_12, %c0_13], %18 {strides = array<i32>} : memref<2x1xf32, #tpu.memory_space<vmem>>, vector<2x1xf32>,
    return
  }
  func.func @transform_0(%arg0: i32) -> (i32, i32) {
    %c0_i32 = arith.constant 0 : i32
    %c0_i32_0 = arith.constant 0 : i32
    return %arg0, %c0_i32 : i32, i32
  }
  func.func @transform_1(%arg0: i32) -> (i32, i32) {
    %c0_i32 = arith.constant 0 : i32
    %c0_i32_0 = arith.constant 0 : i32
    %c0_i32_1 = arith.constant 0 : i32
    return %c0_i32, %c0_i32_0 : i32, i32
  }
  func.func @transform_2(%arg0: i32) -> (i32, i32) {
    %c0_i32 = arith.constant 0 : i32
    %c0_i32_0 = arith.constant 0 : i32
    %c0_i32_1 = arith.constant 0 : i32
    return %c0_i32, %c0_i32_0 : i32, i32
  }
  func.func @transform_3(%arg0: i32) -> (i32, i32) {
    %c0_i32 = arith.constant 0 : i32
    %c0_i32_0 = arith.constant 0 : i32
    %c0_i32_1 = arith.constant 0 : i32
    return %c0_i32, %c0_i32_0 : i32, i32
  }
  func.func @transform_4(%arg0: i32) -> (i32, i32) {
    %c0_i32 = arith.constant 0 : i32
    %c0_i32_0 = arith.constant 0 : i32
    %c0_i32_1 = arith.constant 0 : i32
    return %c0_i32, %c0_i32_0 : i32, i32
  }
  func.func @transform_5(%arg0: i32) -> (i32, i32) {
    %c0_i32 = arith.constant 0 : i32
    %c0_i32_0 = arith.constant 0 : i32
    return %arg0, %c0_i32 : i32, i32
  }
}

</mosaic_0001>

<bundles_post_ra>
// kernel: tpu_custom_call.1
= control target key start
LH: loop header
LB: loop body
LE: loop exit
PB: predicated region body
PF: predicated region fallthrough
CT: control target
= control target key end

     0   :  { %11 = vsyncpa [#allocation4], 0  ;;  %s450_s0 = inlined_call_operand.hbm [shape: f32[2,32], index: 0, kind: input, shape index: {}]   ;;  %s451_s1 = inlined_call_operand.hbm [shape: f32[32,32], index: 1, kind: input, shape index: {}]   ;;  %s452_s2 = inlined_call_operand.hbm [shape: f32[1,32], index: 2, kind: input, shape index: {}]   ;;  %s453_s3 = inlined_call_operand.hbm [shape: f32[1,32], index: 3, kind: input, shape index: {}]   ;;  %s454_s4 = inlined_call_operand.<no memory space> [shape: f32[1,1], index: 4, kind: input, shape index: {}]   ;;  %s455_s5 = inlined_call_operand.hbm [shape: f32[2,1], index: 5, kind: output, shape index: {}]  }
   0x1   :  { %12 = vsyncpa [#allocation7], 0 }
   0x2   :  { %13 = vsyncpa [#allocation10], 0 }
   0x3   :  { %14 = vsyncpa [#allocation5], 0  ;;  %s347_s18 = smov [#allocation6]   ;;  %s229_s22 = scalar_lea.hbm %s451_s1, 512 }
   0x4   :  { %s30_s19 = sshll.u32 %s347_s18, 4  ;;  %p230_p0 = scmp.ne.s32.totalorder %s451_s1, %s229_s22  ;;  %s31_s19 = int_to_ptr.vmem [resolvable:$true] %s30_s19 }
   0x5   :  { %p233_p1 = scmp.lt.u32.totalorder %s229_s22, %s451_s1 }
   0x7   :  { %p235_p2 = pnand %p233_p1, %p230_p0 }
   0x9   :  { %238 = shalt.err (!%p235_p2)
}
   0xa   :  { %s239_s27 = scalar_lea.vmem %s31_s19, 512  ;;  %p244_p4 = scmp.lt.s32.totalorder %s31_s19, %s31_s19 }
   0xb   :  { %p240_p3 = scmp.ne.s32.totalorder %s31_s19, %s239_s27  ;;  %p245_p5 = scmp.lt.s32.totalorder %s239_s27, %s239_s27 }
   0xd   :  { %p246_p6 = por %p245_p5, %p244_p4 }
   0xf   :  { %p247_p7 = pnand %p246_p6, %p240_p3 }
  0x11   :  { %250 = shalt.err (!%p247_p7)
}
  0x12   :  { %s348_s28 = smov 128   ;;  %s349_s29 = smov 8  }
  0x13   :  { %36 = dma.hbm_to_vmem [thread:$0]  %s451_s1, 512, %s31_s19, [#allocation7], %s348_s28, %s348_s28, %s349_s29  }
  0x14   :  { %s350_s7 = smov [#allocation3]   ;;  %s351_s9 = smov [#allocation8]  }
  0x15   :  { %s21_s8 = sshll.u32 %s350_s7, 4  ;;  %s43_s10 = sshll.u32 %s351_s9, 4  ;;  %s22_s8 = int_to_ptr.vmem [resolvable:$true] %s21_s8  ;;  %s44_s10 = int_to_ptr.vmem [resolvable:$true] %s43_s10 }
  0x16   :  { %s251_s13 = scalar_lea.hbm %s450_s0, 32 }
  0x17   :  { %p252_p8 = scmp.ne.s32.totalorder %s450_s0, %s251_s13  ;;  %p255_p9 = scmp.lt.u32.totalorder %s251_s13, %s450_s0 }
  0x19   :  { %p257_p10 = pnand %p255_p9, %p252_p8 }
  0x1b   :  { %260 = shalt.err (!%p257_p10)
}
  0x1c   :  { %s261_s1 = scalar_lea.vmem %s22_s8, 32  ;;  %p266_p12 = scmp.lt.s32.totalorder %s22_s8, %s22_s8 }
  0x1d   :  { %p262_p11 = scmp.ne.s32.totalorder %s22_s8, %s261_s1  ;;  %p267_p13 = scmp.lt.s32.totalorder %s261_s1, %s261_s1 }
  0x1f   :  { %p268_p0 = por %p267_p13, %p266_p12 }
  0x21   :  { %p269_p1 = pnand %p268_p0, %p262_p11 }
  0x23   :  { %272 = shalt.err (!%p269_p1)
}
  0x24   :  { %24 = dma.hbm_to_vmem [thread:$0]  %s450_s0, 32, %s22_s8, [#allocation4]  }
  0x25   :  { %s273_s22 = scalar_lea.hbm %s452_s2, 16 }
  0x26   :  { %p274_p2 = scmp.ne.s32.totalorder %s452_s2, %s273_s22  ;;  %p277_p3 = scmp.lt.u32.totalorder %s273_s22, %s452_s2 }
  0x28   :  { %p279_p4 = pnand %p277_p3, %p274_p2 }
  0x2a   :  { %282 = shalt.err (!%p279_p4)
}
  0x2b   :  { %s283_s27 = scalar_lea.vmem %s44_s10, 16  ;;  %s287_s28 = scalar_lea.vmem %s44_s10, 32 }
  0x2c   :  { %p284_p5 = scmp.ne.s32.totalorder %s44_s10, %s283_s27  ;;  %p288_p6 = scmp.lt.s32.totalorder %s44_s10, %s44_s10 }
  0x2d   :  { %p289_p7 = scmp.lt.s32.totalorder %s287_s28, %s283_s27 }
  0x2f   :  { %p290_p8 = por %p289_p7, %p288_p6 }
  0x31   :  { %p291_p9 = pnand %p290_p8, %p284_p5 }
  0x33   :  { %294 = shalt.err (!%p291_p9)
}
  0x34   :  { %46 = dma.hbm_to_vmem [thread:$0]  %s452_s2, 16, %s44_s10, [#allocation7]  }
  0x35   :  { %s352_s30 = smov [#allocation9]   ;;  %s295_s9 = scalar_lea.hbm %s453_s3, 16 }
  0x36   :  { %s53_s6 = sshll.u32 %s352_s30, 4  ;;  %p296_p10 = scmp.ne.s32.totalorder %s453_s3, %s295_s9  ;;  %s54_s6 = int_to_ptr.vmem [resolvable:$true] %s53_s6 }
  0x37   :  { %p299_p11 = scmp.lt.u32.totalorder %s295_s9, %s453_s3 }
  0x39   :  { %p301_p12 = pnand %p299_p11, %p296_p10 }
  0x3b   :  { %304 = shalt.err (!%p301_p12)
}
  0x3c   :  { %s305_s15 = scalar_lea.vmem %s54_s6, 16  ;;  %s309_s2 = scalar_lea.vmem %s54_s6, 32 }
  0x3d   :  { %p306_p13 = scmp.ne.s32.totalorder %s54_s6, %s305_s15  ;;  %p310_p0 = scmp.lt.s32.totalorder %s54_s6, %s54_s6 }
  0x3e   :  { %p311_p1 = scmp.lt.s32.totalorder %s309_s2, %s305_s15 }
  0x40   :  { %p312_p2 = por %p311_p1, %p310_p0 }
  0x42   :  { %p313_p3 = pnand %p312_p2, %p306_p13 }
  0x44   :  { %316 = shalt.err (!%p313_p3)
}
  0x45   :  { %56 = dma.hbm_to_vmem [thread:$0]  %s453_s3, 16, %s54_s6, [#allocation10]  }
  0x46   :  { %339 = dma.done.wait [#allocation4], 32  }
  0x47   :  { %340 = vsyncadd [#allocation4], 4294967264 }
  0x48   :  { %341 = dma.done.wait [#allocation7], 528  }
  0x49   :  { %342 = vsyncadd [#allocation7], 4294966768 }
  0x4a   :  { %343 = dma.done.wait [#allocation10], 16  }
  0x4b   :  { %344 = vsyncadd [#allocation10], 4294967280  ;;  %v353_v0 = vmov 0.0|0.0   ;;  %vm354_vm0 = vmmov 0   ;;  %v355_v1 = vmov 0.0   ;;  %v72_v2 = vld [vmem:[#allocation6] sm:$0xff]  ;;  %v173_v18 = vstv %s454_s4 }
  0x4c   :  { %213 = vmatprep.subr.bf16.mxu0 %v353_v0  ;;  %210 = vmatprep.mubr.msk.f32.mxu0 %vm354_vm0, %v355_v1  ;;  %v73_v3 = vld [vmem:[#allocation6 + $0x8] sm:$0xff]  ;;  %v74_v4 = vld [vmem:[#allocation6 + $0x10] sm:$0xff]  ;;  %v75_v6 = vld [vmem:[#allocation6 + $0x18] sm:$0xff]  ;;  %vm83_vm1 = vcmask 261120   ;;  %vm168_vm3 = vcmask 254976   ;;  %s356_s1 = smov [#allocation11]  }
  0x4d   :  { %v214_v5 = vpack.c.bf16 %v73_v3, %v72_v2  ;;  %v217_v7 = vpack.c.bf16 %v75_v6, %v74_v4  ;;  %v71_v8 = vld [vmem:[#allocation3] sm:$0x3]  ;;  %v194_v9 = vld [vmem:[#allocation8] ss:$0 sm:$0xff]  ;;  %v196_v14 = vld [vmem:[#allocation9] ss:$0 sm:$0xff] }
  0x4e   :  { %s183_s18 = sshll.u32 %s356_s1, 4  ;;  %vm175_vm4 = vcmask 1024   ;;  %s184_s18 = int_to_ptr.vmem [resolvable:$true] %s183_s18 }
  0x4f   :  { %215 = vmatpush3.bf16.msra.mxu0 %v214_v5  ;;  %s317_s19 = scalar_lea.vmem %s184_s18, 32  ;;  %p322_p5 = scmp.lt.s32.totalorder %s184_s18, %s184_s18 }
  0x50   :  { %216 = vmatprep.subr.bf16.mxu0 %v353_v0  ;;  %p318_p4 = scmp.ne.s32.totalorder %s184_s18, %s317_s19  ;;  %p323_p6 = scmp.lt.s32.totalorder %s317_s19, %s317_s19 }
  0x52   :  { %p324_p7 = por %p323_p6, %p322_p5 }
  0x53   :  { %218 = vmatpush3.bf16.msra.mxu0 %v217_v7 }
  0x54   :  { %p325_p8 = pnand %p324_p7, %p318_p4 }
  0x56   :  { %211 = vmatmul.mubr.msk.f32.vlgmr.msra.gmra.mrb[0].mxu0 %vm83_vm1, %v71_v8 }
 0x129   :  { %v153_v10 = vpop.f32.mrb[0].mxu0 }
 0x12a   :  { %v154_v11 = vadd.f32 %v194_v9, %v153_v10  ;;  %v212_v12 = vpop.f32.mrb[1].mxu0 }
 0x12c   :  { %v158_v13 = vmul.f32 0.2, %v154_v11  ;;  %vm157_vm2 = vcmp.gt.f32.partialorder %v154_v11, 0.0 }
 0x12e   :  { %v159_v15 = vsel %vm157_vm2, %v154_v11, %v158_v13 }
 0x12f   :  { %v167_v16 = vmul.f32 %v196_v14, %v159_v15 }
 0x131   :  { %v169_v17 = vsel %vm168_vm3, %v167_v16, 0.0 }
 0x132   :  { %170 = vadd.xlane.f32.xlu0 %v169_v17 }
 0x1bf   :  { %v171_v19 = vpop.xlane.xlu0 %170 }
 0x1c0   :  { %v174_v20 = vadd.f32 %v173_v18, %v171_v19 }
 0x1c2   :  { %176 = vst.msk [vmem:[#allocation11] sm:$0x3] %vm175_vm4, %v174_v20 }
 0x1c3   :  { %328 = shalt.err (!%p325_p8)
}
 0x1c4   :  { %s329_s22 = scalar_lea.hbm %s455_s5, 32 }
 0x1c5   :  { %p330_p9 = scmp.ne.s32.totalorder %s455_s5, %s329_s22  ;;  %p333_p10 = scmp.lt.u32.totalorder %s329_s22, %s455_s5 }
 0x1c7   :  { %p335_p11 = pnand %p333_p10, %p330_p9 }
 0x1c9   :  { %338 = shalt.err (!%p335_p11)
}
 0x1ca   :  { %186 = dma.vmem_to_hbm [thread:$0]  %s184_s18, 32, %s455_s5, [#allocation5]  }
 0x1cb   :  { %345 = dma.done.wait [#allocation5], 32  }
 0x1cc   :  { %346 = vsyncadd [#allocation5], 4294967264 }
 0x1cd   :  { %190 = vsyncpa [#allocation4], 1 }
 0x1ce   :  { %191 = vsyncpa [#allocation7], 1 }
 0x1cf   :  { %192 = vsyncpa [#allocation10], 1 }
 0x1d0   :  { %193 = vsyncpa [#allocation5], 1 }

</bundles_post_ra>
